<compile_context>
chip_gen: v5e
topology: v5e:2x2
jax: 0.10.0
libtpu: 0.0.40
codegen_flags: <defaults>
</compile_context>

<pallas_src>
import jax
import jax.numpy as jnp
from jax.experimental import pallas as pl
from jax.experimental.pallas import tpu as pltpu


# ----------------------------------------------------------------------------
# Forward pass — faithful to the reference module (empty body -> None).
# ----------------------------------------------------------------------------
def image_discriminator_forward(images, domains, contents):
    """Matches ImageDiscriminator.forward exactly: the body is `pass`."""
    del images, domains, contents
    return None


# ----------------------------------------------------------------------------
# Debug-only Pallas identity kernel (not part of the forward hot path).
# ----------------------------------------------------------------------------
def _copy_kernel(x_ref, o_ref):
    # Pure VMEM tile copy; (8k, 128m) blocks -> full vregs, unmasked vst.
    o_ref[...] = x_ref[...]


_SUBLANE = 8
_LANE = 128
_TARGET_BLOCK_BYTES = 2 * 1024 * 1024   # ~2 MiB blocks amortize per-step overhead
_MAX_BLOCK_BYTES = 4 * 1024 * 1024      # 2x(in) + 2x(out) buffers <= 16 MiB (v7x-safe)
_MAX_VMEM_BYTES = 32 * 1024 * 1024      # never request more scoped VMEM than this


def _plan_slab(n_elems):
    """Pad N up to a multiple of 8*128 and factor it into (rows, lanes)
    with rows a multiple of 8 and lanes a multiple of 128."""
    n_pad = pl.cdiv(n_elems, _SUBLANE * _LANE) * (_SUBLANE * _LANE)
    for lanes in (2048, 1024, 512, 256, 128):
        if n_pad % lanes == 0:
            rows = n_pad // lanes
            if rows >= _SUBLANE and rows % _SUBLANE == 0:
                return n_pad, rows, lanes
    # Unreachable: lanes == 128 always satisfies the conditions above.
    return n_pad, n_pad // _LANE, _LANE


def _plan_tiles(rows, lanes, itemsize):
    """Pick (row_tile, lane_tile) from a VMEM byte budget, keeping the grid
    multi-step so the pipeline overlaps and v7x can shard across its 2 TCs."""
    # Lane tile: full lane extent unless a single 8-row stripe exceeds target.
    lane_tile = lanes
    while lane_tile > _LANE and _SUBLANE * lane_tile * itemsize > _TARGET_BLOCK_BYTES:
        lane_tile //= 2
    # Row tile: grow in sublane units toward the target, never past the cap.
    row_tile = _SUBLANE
    while (row_tile * 2 <= rows
           and rows % (row_tile * 2) == 0
           and row_tile * 2 * lane_tile * itemsize <= _TARGET_BLOCK_BYTES):
        row_tile *= 2
    assert row_tile * lane_tile * itemsize <= _MAX_BLOCK_BYTES
    # Guarantee >= 2 grid steps when the slab allows it (v7x megacore).
    if (rows // row_tile) * (lanes // lane_tile) < 2:
        if lane_tile >= 2 * _LANE:
            lane_tile //= 2
        elif row_tile >= 2 * _SUBLANE:
            row_tile //= 2
    return row_tile, lane_tile


@jax.jit
def _debug_identity_copy(images):
    """Round-trips the image batch through a tiled, pipelined Pallas copy."""
    n = images.size
    itemsize = images.dtype.itemsize
    n_pad, rows, lanes = _plan_slab(n)
    row_tile, lane_tile = _plan_tiles(rows, lanes, itemsize)

    flat = images.reshape(-1)
    if n_pad != n:
        flat = jnp.pad(flat, (0, n_pad - n))
    slab = flat.reshape(rows, lanes)

    block_bytes = row_tile * lane_tile * itemsize
    # <= 32 MiB always; enough headroom for 2x(in)+2x(out) double buffers.
    vmem_limit = int(min(_MAX_VMEM_BYTES, max(8 * 1024 * 1024, 6 * block_bytes)))
    grid = (rows // row_tile, lanes // lane_tile)

    out = pl.pallas_call(
        _copy_kernel,
        out_shape=jax.ShapeDtypeStruct(slab.shape, slab.dtype),
        grid=grid,
        in_specs=[pl.BlockSpec((row_tile, lane_tile), lambda i, j: (i, j))],
        out_specs=pl.BlockSpec((row_tile, lane_tile), lambda i, j: (i, j)),
        input_output_aliases={0: 0},  # no separate output allocation / writeback
        compiler_params=pltpu.CompilerParams(
            dimension_semantics=("parallel", "parallel"),  # shard across TCs on v7x
            vmem_limit_bytes=vmem_limit,
        ),
    )(slab)
    return out.reshape(-1)[:n].reshape(images.shape)


if __name__ == "__main__":
    key = jax.random.PRNGKey(0)
    k_img, k_dom, k_con = jax.random.split(key, 3)

    B, C, H, W = 2, 4, 16, 16
    num_domains, num_contents = 3, 5

    images = jax.random.normal(k_img, (B, C, H, W), dtype=jnp.float32)
    domains = jax.random.normal(k_dom, (B, num_domains), dtype=jnp.float32)
    contents = jax.random.normal(k_con, (B, num_contents), dtype=jnp.float32)

    # Faithful forward: returns None with no device work (reference body is `pass`).
    result = image_discriminator_forward(images, domains, contents)
    assert result is None

    # Exercise the Pallas kernel once (debug path only, outside the forward).
    out = _debug_identity_copy(images)
    jax.block_until_ready(out)
    # Cheap one-time verification (not on any hot path): identity is bit-exact.
    assert bool(jnp.array_equal(out, images))

    print("KERNEL_OK")
</pallas_src>

<mosaic_0001>
module attributes {stable_mosaic.version = 11 : i64} {
  func.func @_copy_kernel(%arg0: i32, %arg1: i32, %arg2: memref<8x128xf32, #tpu.memory_space<vmem>>, %arg3: memref<8x128xf32, #tpu.memory_space<vmem>>) attributes {dimension_semantics = [#tpu.dimension_semantics<parallel>, #tpu.dimension_semantics<parallel>], iteration_bounds = array<i64: 1, 2>, scalar_prefetch = 0 : i64, scratch_operands = 0 : i64, tpu.core_type = #tpu.core_type<tc>, window_params = [{transform_indices = @transform_0, window_bounds = array<i64: 8, 128>}, {transform_indices = @transform_1, window_bounds = array<i64: 8, 128>}]} {
    %c0 = arith.constant 0 : index
    %c0_0 = arith.constant 0 : index
    %0 = vector.load %arg2[%c0, %c0_0] : memref<8x128xf32, #tpu.memory_space<vmem>>, vector<8x128xf32>
    %c0_1 = arith.constant 0 : index
    %c0_2 = arith.constant 0 : index
    %1 = vector.load %arg3[%c0_1, %c0_2] : memref<8x128xf32, #tpu.memory_space<vmem>>, vector<8x128xf32>
    tpu.vector_store %arg3[%c0_1, %c0_2], %0 {strides = array<i32>} : memref<8x128xf32, #tpu.memory_space<vmem>>, vector<8x128xf32>,
    return
  }
  func.func @transform_0(%arg0: i32, %arg1: i32) -> (i32, i32) {
    %c0_i32 = arith.constant 0 : i32
    return %arg0, %arg1 : i32, i32
  }
  func.func @transform_1(%arg0: i32, %arg1: i32) -> (i32, i32) {
    %c0_i32 = arith.constant 0 : i32
    return %arg0, %arg1 : i32, i32
  }
}

</mosaic_0001>

<bundles_post_ra>
// kernel: _debug_identity_copy.1
= control target key start
LH: loop header
LB: loop body
LE: loop exit
PB: predicated region body
PF: predicated region fallthrough
CT: control target
= control target key end

     0   :  { %s278_s6 = smov 0   ;;  %s282_s7 = smov 0   ;;  %s306_s0 = inlined_call_operand.vmem [shape: f32[8,256], index: 0, kind: input, shape index: {}, may-alias: {0,1}]   ;;  %s307_s1 = inlined_call_operand.vmem [shape: f32[8,256], index: 1, kind: output, shape index: {}, may-alias: {0,1}]  }
   0x1   :  { %s286_s8 = smov 0  }
   0x2 LB: > { %s20_s9 = sadd.s32 1, %s284_s7  ;;  %p237_p0 = scmp.ge.s32.totalorder %s288_s8, 1  ;;  %s288_s8 = sphi %s286_s8, %s11_s8   ;;  %s284_s7 = sphi %s282_s7, %s283_s7   ;;  %s280_s6 = sphi %s278_s6, %s279_s6  }
   0x3   : > { %p21_p1 = scmp.ge.s32.totalorder %s20_s9, 2  ;;  %p106_p2 = scmp.lt.s32.totalorder %s288_s8, 3 }
   0x5   : > { %s309_s9 = smov (%p21_p1, %s20_s9), 0  ;;  %p107_p3 = pnand %p237_p0, %p106_p2 }
   0x6   : > { %p134_p4 = scmp.lt.s32.totalorder (!%p107_p3), %s280_s6, 1 }
   0x7   : > { %110 = sbr.rel (%p107_p3) target bundleno = 17 (0x11), region = 24 }
   0xc   : > { %s311_s6 = smov (!%p134_p4, %s280_s6), 1 }
   0xd   : > { %s238_s10 = sshll.u32 %s311_s6, 3 }
   0xe   : > { %s139_s13 = scalar_lea.vmem %s306_s0, %s238_s10  ;;  %s147_s16 = scalar_lea.vmem %s307_s1, %s238_s10 }
   0xf   : > { %v148_v0 = vld [vmem:[%s139_s13] sm:$0xff] }
  0x10   : > { %149 = vst [vmem:[%s147_s16] sm:$0xff] %v148_v0 }
  0x11 PF: > { %s11_s8 = sadd.s32 1, %s288_s8   ;;  %s279_s6 = smov %s284_s7  }
  0x12   : > { %p8_p5 = scmp.ge.s32.totalorder %s11_s8, 4   ;;  %s283_s7 = smov %s309_s9  }
  0x14   :  { %10 = sbr.rel (!%p8_p5) target bundleno = 2 (0x2), region = 54 }

</bundles_post_ra>
